<compile_context>
chip_gen: v7x
topology: tpu7x:2x2x1
jax: 0.10.0
libtpu: 0.0.40
codegen_flags: <defaults>
</compile_context>

<pallas_src>
import functools

import jax
import jax.numpy as jnp
from jax import lax
from jax.experimental import pallas as pl
from jax.experimental.pallas import tpu as pltpu

BN_EPS = 1e-5
KSIZE = 9
PAD = (KSIZE - 1) // 2
C_PAD = 128                  # lane-dense channel width carried between layers
HIDDEN = 96
MXU_PRECISION = lax.Precision.HIGHEST   # exact f32 matmuls (match PyTorch f32)
VMEM_LIMIT = 48 * 1024 * 1024           # fits v7x's 64 MiB VMEM with headroom


# ---------------------------------------------------------------------------
# traced helpers used inside the kernels
# ---------------------------------------------------------------------------
def _tap_groups(cin):
    """Group the 9 conv taps into contracted-K chunks for the MXU.

    * Layer 1 (cin = input_channels, e.g. 4): one im2col dot with K = 9*cin
      (=36) instead of nine K=4 dots (~9x fewer MXU pushes).
    * Hidden layers (cin = 128): fold taps pairwise -> four K=256 dots plus
      one K=128 dot, filling the 256-deep MXU on v6e/v7x (correct on v5e too).
    """
    if cin * KSIZE <= 256:
        return [list(range(KSIZE))]
    fold = 2
    return [list(range(k, min(k + fold, KSIZE))) for k in range(0, KSIZE, fold)]


def _conv_taps(x, w_ref, b_ref, tb, L, cin):
    """'same' Conv1d(k=9) for TB sequences as a few big MXU matmuls.

    x:     (TB, L, cin)  f32 activations.
    w_ref: (KSIZE*cin, C_PAD) f32 weights, rows ordered (tap, cin).
    b_ref: (1, C_PAD) f32 bias.
    ->     (TB*L, C_PAD) f32 conv output.
    """
    halo = jnp.zeros((tb, PAD, cin), jnp.float32)       # in-VMEM 'same' padding
    xp = jnp.concatenate([halo, x, halo], axis=1)       # (TB, L + 8, cin)
    acc = jnp.zeros((tb * L, C_PAD), jnp.float32)
    for grp in _tap_groups(cin):                        # static -> unrolled
        xg = jnp.concatenate([xp[:, k:k + L, :] for k in grp], axis=-1)
        xg = xg.reshape(tb * L, len(grp) * cin)         # M = TB*L slab
        wg = w_ref[grp[0] * cin:(grp[-1] + 1) * cin, :]
        acc = acc + jnp.dot(xg, wg,
                            preferred_element_type=jnp.float32,
                            precision=MXU_PRECISION)
    return acc + b_ref[...]


def _accum_stats(acc, stats_ref):
    """Accumulate per-channel sum / sum-of-squares across the batch grid axis."""
    s = jnp.sum(acc, axis=0, keepdims=True)
    ss = jnp.sum(acc * acc, axis=0, keepdims=True)

    @pl.when(pl.program_id(0) == 0)
    def _():
        stats_ref[...] = jnp.zeros_like(stats_ref)

    stats_ref[...] += jnp.concatenate([s, ss], axis=0)


def _normalize(x, stats, gamma, beta, inv_count, relu):
    """Training-mode BatchNorm1d from accumulated sum/sumsq, optional ReLU.

    Variance is E[x^2] - E[x]^2 in f32; fine at these magnitudes (BN-scale
    activations), avoids a second full pass over the activations."""
    mean = stats[0:1, :] * inv_count
    var = jnp.maximum(stats[1:2, :] * inv_count - mean * mean, 0.0)
    y = (x - mean) * lax.rsqrt(var + BN_EPS) * gamma + beta
    return jnp.maximum(y, 0.0) if relu else y


# ---------------------------------------------------------------------------
# kernels
# ---------------------------------------------------------------------------
def _conv_stats_kernel(x_ref, w_ref, b_ref, o_ref, stats_ref, *, tb, L, cin):
    """Layer-1 conv on the raw input + per-channel sum/sumsq accumulation."""
    acc = _conv_taps(x_ref[...], w_ref, b_ref, tb, L, cin)
    o_ref[...] = acc.reshape(tb, L, C_PAD)
    _accum_stats(acc, stats_ref)


def _norm_conv_stats_kernel(x_ref, stats_in_ref, g_ref, beta_ref, w_ref, b_ref,
                            o_ref, stats_out_ref, *, tb, L, inv_count, c_out):
    """Fused: BN+ReLU of the previous layer, then conv of this layer + stats."""
    y = _normalize(x_ref[...], stats_in_ref[...], g_ref[...], beta_ref[...],
                   inv_count, relu=True)
    acc = _conv_taps(y, w_ref, b_ref, tb, L, C_PAD)
    o_ref[...] = acc.reshape(tb, L, C_PAD)[:, :, :c_out]
    _accum_stats(acc, stats_out_ref)


def _norm_kernel(x_ref, stats_ref, g_ref, beta_ref, o_ref, *, inv_count):
    """Final BatchNorm1d (no ReLU) on the num_classes-channel conv output."""
    o_ref[...] = _normalize(x_ref[...], stats_ref[...], g_ref[...],
                            beta_ref[...], inv_count, relu=False)


# ---------------------------------------------------------------------------
# pallas_call wrappers
# ---------------------------------------------------------------------------
def _full_spec(shape):
    """Whole-array block, independent of the grid position."""
    n = len(shape)
    return pl.BlockSpec(shape, lambda i, _n=n: (0,) * _n)


def _pick_tb(B):
    """Batch several sequences per grid step (raise the per-dot M dimension)."""
    for tb in (8, 4, 2, 1):
        if B % tb == 0:
            return tb
    return 1


def conv_stats(x, w, b, tb):
    B, L, cin = x.shape
    return pl.pallas_call(
        functools.partial(_conv_stats_kernel, tb=tb, L=L, cin=cin),
        grid=(B // tb,),
        in_specs=[pl.BlockSpec((tb, L, cin), lambda i: (i, 0, 0)),
                  _full_spec(w.shape),
                  _full_spec(b.shape)],
        out_specs=(pl.BlockSpec((tb, L, C_PAD), lambda i: (i, 0, 0)),
                   _full_spec((2, C_PAD))),
        out_shape=(jax.ShapeDtypeStruct((B, L, C_PAD), jnp.float32),
                   jax.ShapeDtypeStruct((2, C_PAD), jnp.float32)),
        compiler_params=pltpu.CompilerParams(
            dimension_semantics=("arbitrary",),     # stats accumulate across B
            vmem_limit_bytes=VMEM_LIMIT),
    )(x, w, b)


def norm_conv_stats(x, stats, gamma, beta, w, b, count, tb, c_out):
    B, L, c = x.shape
    return pl.pallas_call(
        functools.partial(_norm_conv_stats_kernel, tb=tb, L=L,
                          inv_count=1.0 / count, c_out=c_out),
        grid=(B // tb,),
        in_specs=[pl.BlockSpec((tb, L, c), lambda i: (i, 0, 0)),
                  _full_spec(stats.shape),
                  _full_spec(gamma.shape),
                  _full_spec(beta.shape),
                  _full_spec(w.shape),
                  _full_spec(b.shape)],
        out_specs=(pl.BlockSpec((tb, L, c_out), lambda i: (i, 0, 0)),
                   _full_spec((2, C_PAD))),
        out_shape=(jax.ShapeDtypeStruct((B, L, c_out), jnp.float32),
                   jax.ShapeDtypeStruct((2, C_PAD), jnp.float32)),
        compiler_params=pltpu.CompilerParams(
            dimension_semantics=("arbitrary",),
            vmem_limit_bytes=VMEM_LIMIT),
    )(x, stats, gamma, beta, w, b)


def norm_final(x, stats, gamma, beta, count, tb):
    B, L, c = x.shape
    return pl.pallas_call(
        functools.partial(_norm_kernel, inv_count=1.0 / count),
        grid=(B // tb,),
        in_specs=[pl.BlockSpec((tb, L, c), lambda i: (i, 0, 0)),
                  _full_spec(stats.shape),
                  _full_spec(gamma.shape),
                  _full_spec(beta.shape)],
        out_specs=pl.BlockSpec((tb, L, c), lambda i: (i, 0, 0)),
        out_shape=jax.ShapeDtypeStruct((B, L, c), jnp.float32),
        compiler_params=pltpu.CompilerParams(
            dimension_semantics=("parallel",),      # pure elementwise tail
            vmem_limit_bytes=VMEM_LIMIT),
    )(x, stats, gamma, beta)


# ---------------------------------------------------------------------------
# parameters & model
# ---------------------------------------------------------------------------
def init_params(key, input_channels=4, num_classes=2):
    """Matches __init__: kaiming_normal_(fan_out, relu) conv weights, conv
    bias = 0, BN weight = 1, BN bias = 0.  Weights are stored flattened to
    (KSIZE*cin_store, C_PAD), tap-major, with zero padding for the unused
    in/out channels, in f32."""
    assert HIDDEN <= C_PAD and num_classes <= C_PAD

    def conv_init(k, cin, cout, cin_store):
        std = (2.0 / (cout * KSIZE)) ** 0.5            # fan_out = C_out * K
        w = jax.random.normal(k, (cout, cin, KSIZE), jnp.float32) * std
        w = jnp.transpose(w, (2, 1, 0))                # (K, cin, cout)
        w_full = jnp.zeros((KSIZE, cin_store, C_PAD), jnp.float32)
        w_full = w_full.at[:, :cin, :cout].set(w)
        return {"w": w_full.reshape(KSIZE * cin_store, C_PAD),
                "b": jnp.zeros((1, C_PAD), jnp.float32),
                "gamma": jnp.ones((1, C_PAD), jnp.float32),
                "beta": jnp.zeros((1, C_PAD), jnp.float32)}

    layers = []
    cin, cin_store = input_channels, input_channels
    for _ in range(4):
        key, sub = jax.random.split(key)
        layers.append(conv_init(sub, cin, HIDDEN, cin_store))
        cin, cin_store = HIDDEN, C_PAD
    key, sub = jax.random.split(key)
    final = conv_init(sub, HIDDEN, num_classes, C_PAD)
    return layers, final


def cnn_sequence_model(x, layers, final, num_classes):
    """x: (B, L, input_channels) -> (B, L, num_classes)."""
    B, L, _ = x.shape
    count = B * L
    tb = _pick_tb(B)

    # layer 1: conv + stats on the raw input
    h, stats = conv_stats(x, layers[0]["w"], layers[0]["b"], tb)

    # layers 2..4 and the final conv: fuse BN+ReLU(prev) with conv(next)
    chain = layers[1:] + [final]
    for idx, p in enumerate(chain):
        prev = layers[idx]
        c_out = num_classes if idx == len(chain) - 1 else C_PAD
        h, stats = norm_conv_stats(h, stats, prev["gamma"], prev["beta"],
                                   p["w"], p["b"], count, tb, c_out)

    # final BatchNorm1d (no ReLU) on the already-narrow (B, L, nc) output
    return norm_final(h, stats[:, :num_classes],
                      final["gamma"][:, :num_classes],
                      final["beta"][:, :num_classes], count, tb)


# ---------------------------------------------------------------------------
# pure-JAX reference (same f32 math)
# ---------------------------------------------------------------------------
def _ref_layer(x, p, relu, count):
    B, L, _ = x.shape
    cin_store = p["w"].shape[0] // KSIZE
    w = p["w"].reshape(KSIZE, cin_store, C_PAD)
    xp = jnp.pad(x, ((0, 0), (PAD, PAD), (0, 0)))
    acc = jnp.zeros((B, L, C_PAD), jnp.float32)
    for k in range(KSIZE):
        acc = acc + jnp.einsum("blc,cd->bld", xp[:, k:k + L, :], w[k],
                               preferred_element_type=jnp.float32,
                               precision=MXU_PRECISION)
    acc = acc + p["b"][None]
    inv = 1.0 / count
    mean = acc.sum(axis=(0, 1), keepdims=True) * inv
    var = jnp.maximum((acc * acc).sum(axis=(0, 1), keepdims=True) * inv
                      - mean * mean, 0.0)
    y = (acc - mean) * lax.rsqrt(var + BN_EPS) * p["gamma"][None] + p["beta"][None]
    return jnp.maximum(y, 0.0) if relu else y


def _ref_model(x, layers, final, num_classes):
    count = x.shape[0] * x.shape[1]
    h = x
    for p in layers:
        h = _ref_layer(h, p, relu=True, count=count)
    h = _ref_layer(h, final, relu=False, count=count)
    return h[..., :num_classes]


if __name__ == "__main__":
    key = jax.random.PRNGKey(0)
    key, pkey, xkey = jax.random.split(key, 3)

    B, L, C_IN, N_CLASSES = 2, 16, 4, 2
    layers, final = init_params(pkey, input_channels=C_IN, num_classes=N_CLASSES)
    x = jax.random.normal(xkey, (B, L, C_IN), jnp.float32)

    out = jax.block_until_ready(cnn_sequence_model(x, layers, final, N_CLASSES))
    assert out.shape == (B, L, N_CLASSES), out.shape

    ref = jax.block_until_ready(_ref_model(x, layers, final, N_CLASSES))
    max_err = float(jnp.max(jnp.abs(out - ref)))
    assert jnp.allclose(out, ref, atol=2e-3, rtol=2e-3), max_err

    print("KERNEL_OK")
</pallas_src>

<mosaic_0001>
module attributes {stable_mosaic.version = 11 : i64} {
  func.func @_conv_stats_kernel(%arg0: i32, %arg1: memref<2x16x4xf32, #tpu.memory_space<vmem>>, %arg2: memref<36x128xf32, #tpu.memory_space<vmem>>, %arg3: memref<1x128xf32, #tpu.memory_space<vmem>>, %arg4: memref<2x16x128xf32, #tpu.memory_space<vmem>>, %arg5: memref<2x128xf32, #tpu.memory_space<vmem>>) attributes {dimension_semantics = [#tpu.dimension_semantics<arbitrary>], iteration_bounds = array<i64: 1>, scalar_prefetch = 0 : i64, scratch_operands = 0 : i64, tpu.core_type = #tpu.core_type<tc>, window_params = [{transform_indices = @transform_0, window_bounds = array<i64: 2, 16, 4>}, {pipeline_mode = #tpu.pipeline_mode<synchronous>, transform_indices = @transform_1, window_bounds = array<i64: 36, 128>}, {pipeline_mode = #tpu.pipeline_mode<synchronous>, transform_indices = @transform_2, window_bounds = array<i64: 1, 128>}, {transform_indices = @transform_3, window_bounds = array<i64: 2, 16, 128>}, {pipeline_mode = #tpu.pipeline_mode<synchronous>, transform_indices = @transform_4, window_bounds = array<i64: 2, 128>}]} {
    %c0 = arith.constant 0 : index
    %c0_0 = arith.constant 0 : index
    %c0_1 = arith.constant 0 : index
    %0 = vector.load %arg1[%c0, %c0_0, %c0_1] : memref<2x16x4xf32, #tpu.memory_space<vmem>>, vector<2x16x4xf32>
    %cst = arith.constant 0.000000e+00 : f32
    %1 = vector.broadcast %cst : f32 to vector<2x4x4xf32>
    %2 = tpu.concatenate %1, %0, %1 in 1 : vector<2x4x4xf32>, vector<2x16x4xf32>, vector<2x4x4xf32> -> vector<2x24x4xf32>
    %cst_2 = arith.constant 0.000000e+00 : f32
    %3 = vector.broadcast %cst_2 : f32 to vector<32x128xf32>
    %4 = vector.extract_strided_slice %2 {offsets = [0, 0, 0], sizes = [2, 16, 4], strides = [1, 1, 1]} : vector<2x24x4xf32> to vector<2x16x4xf32>
    %5 = vector.extract_strided_slice %2 {offsets = [0, 1, 0], sizes = [2, 16, 4], strides = [1, 1, 1]} : vector<2x24x4xf32> to vector<2x16x4xf32>
    %6 = vector.extract_strided_slice %2 {offsets = [0, 2, 0], sizes = [2, 16, 4], strides = [1, 1, 1]} : vector<2x24x4xf32> to vector<2x16x4xf32>
    %7 = vector.extract_strided_slice %2 {offsets = [0, 3, 0], sizes = [2, 16, 4], strides = [1, 1, 1]} : vector<2x24x4xf32> to vector<2x16x4xf32>
    %8 = vector.extract_strided_slice %2 {offsets = [0, 4, 0], sizes = [2, 16, 4], strides = [1, 1, 1]} : vector<2x24x4xf32> to vector<2x16x4xf32>
    %9 = vector.extract_strided_slice %2 {offsets = [0, 5, 0], sizes = [2, 16, 4], strides = [1, 1, 1]} : vector<2x24x4xf32> to vector<2x16x4xf32>
    %10 = vector.extract_strided_slice %2 {offsets = [0, 6, 0], sizes = [2, 16, 4], strides = [1, 1, 1]} : vector<2x24x4xf32> to vector<2x16x4xf32>
    %11 = vector.extract_strided_slice %2 {offsets = [0, 7, 0], sizes = [2, 16, 4], strides = [1, 1, 1]} : vector<2x24x4xf32> to vector<2x16x4xf32>
    %12 = vector.extract_strided_slice %2 {offsets = [0, 8, 0], sizes = [2, 16, 4], strides = [1, 1, 1]} : vector<2x24x4xf32> to vector<2x16x4xf32>
    %13 = tpu.concatenate %4, %5, %6, %7, %8, %9, %10, %11, %12 in 2 : vector<2x16x4xf32>, vector<2x16x4xf32>, vector<2x16x4xf32>, vector<2x16x4xf32>, vector<2x16x4xf32>, vector<2x16x4xf32>, vector<2x16x4xf32>, vector<2x16x4xf32>, vector<2x16x4xf32> -> vector<2x16x36xf32>
    %14 = vector.shape_cast %13 : vector<2x16x36xf32> to vector<32x36xf32>
    %c0_3 = arith.constant 0 : index
    %c0_4 = arith.constant 0 : index
    %15 = vector.load %arg2[%c0_3, %c0_4] : memref<36x128xf32, #tpu.memory_space<vmem>>, vector<36x128xf32>
    %cst_5 = arith.constant dense<0.000000e+00> : vector<32x128xf32>
    %16 = tpu.matmul %14, %15, %cst_5 {dimension_numbers = #tpu.dot_dimension_numbers<[1], [0], [0], [1], [0, 0, 1, 1], [], []>, precision = #tpu.contract_precision<fp32>} : vector<32x36xf32>, vector<36x128xf32>, vector<32x128xf32> -> vector<32x128xf32>
    %17 = arith.addf %3, %16 : vector<32x128xf32>
    %c0_6 = arith.constant 0 : index
    %c0_7 = arith.constant 0 : index
    %18 = vector.load %arg3[%c0_6, %c0_7] : memref<1x128xf32, #tpu.memory_space<vmem>>, vector<1x128xf32>
    %19 = vector.broadcast %18 : vector<1x128xf32> to vector<32x128xf32>
    %20 = arith.addf %17, %19 : vector<32x128xf32>
    %21 = vector.shape_cast %20 : vector<32x128xf32> to vector<2x16x128xf32>
    %c0_8 = arith.constant 0 : index
    %c0_9 = arith.constant 0 : index
    %c0_10 = arith.constant 0 : index
    %22 = vector.load %arg4[%c0_8, %c0_9, %c0_10] : memref<2x16x128xf32, #tpu.memory_space<vmem>>, vector<2x16x128xf32>
    tpu.vector_store %arg4[%c0_8, %c0_9, %c0_10], %21 {strides = array<i32>} : memref<2x16x128xf32, #tpu.memory_space<vmem>>, vector<2x16x128xf32>,
    %cst_11 = arith.constant dense<0.000000e+00> : vector<128xf32>
    %23 = vector.multi_reduction <add>, %20, %cst_11 [0] : vector<32x128xf32> to vector<128xf32>
    %24 = vector.shape_cast %23 : vector<128xf32> to vector<1x128xf32>
    %25 = arith.mulf %20, %20 : vector<32x128xf32>
    %cst_12 = arith.constant dense<0.000000e+00> : vector<128xf32>
    %26 = vector.multi_reduction <add>, %25, %cst_12 [0] : vector<32x128xf32> to vector<128xf32>
    %27 = vector.shape_cast %26 : vector<128xf32> to vector<1x128xf32>
    %c0_i32 = arith.constant 0 : i32
    %28 = arith.cmpi eq, %arg0, %c0_i32 : i32
    %29 = arith.extui %28 : i1 to i32
    %c0_i32_13 = arith.constant 0 : i32
    %30 = arith.cmpi ne, %29, %c0_i32_13 : i32
    scf.if %30 {
      %cst_18 = arith.constant 0.000000e+00 : f32
      %35 = vector.broadcast %cst_18 : f32 to vector<2x128xf32>
      %c0_19 = arith.constant 0 : index
      %c0_20 = arith.constant 0 : index
      %36 = vector.load %arg5[%c0_19, %c0_20] : memref<2x128xf32, #tpu.memory_space<vmem>>, vector<2x128xf32>
      tpu.vector_store %arg5[%c0_19, %c0_20], %35 {strides = array<i32>} : memref<2x128xf32, #tpu.memory_space<vmem>>, vector<2x128xf32>,
    } else {
    }
    %c0_14 = arith.constant 0 : index
    %c0_15 = arith.constant 0 : index
    %31 = vector.load %arg5[%c0_14, %c0_15] : memref<2x128xf32, #tpu.memory_space<vmem>>, vector<2x128xf32>
    %32 = tpu.concatenate %24, %27 in 0 : vector<1x128xf32>, vector<1x128xf32> -> vector<2x128xf32>
    %33 = arith.addf %31, %32 : vector<2x128xf32>
    %c0_16 = arith.constant 0 : index
    %c0_17 = arith.constant 0 : index
    %34 = vector.load %arg5[%c0_16, %c0_17] : memref<2x128xf32, #tpu.memory_space<vmem>>, vector<2x128xf32>
    tpu.vector_store %arg5[%c0_16, %c0_17], %33 {strides = array<i32>} : memref<2x128xf32, #tpu.memory_space<vmem>>, vector<2x128xf32>,
    return
  }
  func.func @transform_0(%arg0: i32) -> (i32, i32, i32) {
    %c0_i32 = arith.constant 0 : i32
    %c0_i32_0 = arith.constant 0 : i32
    %c0_i32_1 = arith.constant 0 : i32
    return %arg0, %c0_i32, %c0_i32_0 : i32, i32, i32
  }
  func.func @transform_1(%arg0: i32) -> (i32, i32) {
    %c0_i32 = arith.constant 0 : i32
    %c0_i32_0 = arith.constant 0 : i32
    %c0_i32_1 = arith.constant 0 : i32
    return %c0_i32, %c0_i32_0 : i32, i32
  }
  func.func @transform_2(%arg0: i32) -> (i32, i32) {
    %c0_i32 = arith.constant 0 : i32
    %c0_i32_0 = arith.constant 0 : i32
    %c0_i32_1 = arith.constant 0 : i32
    return %c0_i32, %c0_i32_0 : i32, i32
  }
  func.func @transform_3(%arg0: i32) -> (i32, i32, i32) {
    %c0_i32 = arith.constant 0 : i32
    %c0_i32_0 = arith.constant 0 : i32
    %c0_i32_1 = arith.constant 0 : i32
    return %arg0, %c0_i32, %c0_i32_0 : i32, i32, i32
  }
  func.func @transform_4(%arg0: i32) -> (i32, i32) {
    %c0_i32 = arith.constant 0 : i32
    %c0_i32_0 = arith.constant 0 : i32
    %c0_i32_1 = arith.constant 0 : i32
    return %c0_i32, %c0_i32_0 : i32, i32
  }
}

</mosaic_0001>

<bundles_post_ra>
// kernel: tpu_custom_call.1
= control target key start
LH: loop header
LB: loop body
LE: loop exit
PB: predicated region body
PF: predicated region fallthrough
CT: control target
= control target key end

     0   :  { %10 = vsyncpa [#allocation3], 0  ;;  %vm26_vm0 = vcmask 1043456   ;;  %vm70_vm1 = vcmask 1045504   ;;  %vm47_vm2 = vcmask 1046528   ;;  %s1608_s0 = inlined_call_operand.vmem [shape: f32[2,16,4], index: 0, kind: input, shape index: {}]   ;;  %s1609_s1 = inlined_call_operand.vmem [shape: f32[36,128], index: 1, kind: input, shape index: {}]   ;;  %s1610_s2 = inlined_call_operand.vmem [shape: f32[1,128], index: 2, kind: input, shape index: {}]   ;;  %s1611_s3 = inlined_call_operand.hbm [shape: f32[2,16,128], index: 3, kind: output, shape index: {0}]   ;;  %s1612_s4 = inlined_call_operand.hbm [shape: f32[2,128], index: 4, kind: output, shape index: {1}]  }
   0x1   :  { %v18_v0 = vld [vmem:[%s1608_s0] sm:$0xff]  ;;  %v19_v1 = vld [vmem:[%s1608_s0 + $0x8] sm:$0xff] }
   0x2   :  { %v27_v2 = vrot.slane %v18_v0, 4  ;;  %v28_v3 = vrot.slane %v19_v1, 4 }
   0x4   :  { %v1306_v4 = vsel %vm26_vm0, %v27_v2, %v28_v3  ;;  %v1309_v5 = vsel %vm26_vm0, 0.0, %v27_v2  ;;  %v1312_v6 = vsel %vm26_vm0, %v28_v3, 0.0 }
   0x5   :  { %v71_v7 = vrot.slane %v1309_v5, 2  ;;  %v72_v8 = vrot.slane %v1306_v4, 2  ;;  %v48_v9 = vrot.slane %v1309_v5, 1  ;;  %v49_v10 = vrot.slane %v1306_v4, 1 }
   0x6   :  { %v74_v11 = vrot.slane %v1312_v6, 2  ;;  %v51_v12 = vrot.slane %v1312_v6, 1 }
   0x7   :  { %11 = vsyncpa [#allocation5], 0  ;;  %v73_v13 = vsel %vm70_vm1, %v71_v7, %v72_v8  ;;  %v50_v14 = vsel %vm47_vm2, %v48_v9, %v49_v10  ;;  %s1262_s19 = smov 8   ;;  %s1263_s20 = smov 4   ;;  %v95_v15 = vrot.slane %v1306_v4, 3  ;;  %v97_v18 = vrot.slane %v1312_v6, 3 }
   0x8   :  { %81 = vrot.lane.b32.xlu1 %v73_v13, %s1262_s19  ;;  %58 = vrot.lane.b32.xlu0 %v50_v14, %s1263_s20  ;;  %v75_v16 = vsel %vm70_vm1, %v72_v8, %v74_v11  ;;  %v52_v17 = vsel %vm47_vm2, %v49_v10, %v51_v12  ;;  %v94_v19 = vrot.slane %v1309_v5, 3  ;;  %v20_v20 = vld [vmem:[%s1608_s0 + $0x10] sm:$0xff]  ;;  %vm93_vm3 = vcmask 1044480   ;;  %v21_v21 = vld [vmem:[%s1608_s0 + $0x18] sm:$0xff]  ;;  %s1264_s25 = smov 12   ;;  %s1265_s0 = smov 16  }
   0x9   :  { %v117_v22 = vrot.slane %v1306_v4, 4  ;;  %v30_v23 = vrot.slane %v20_v20, 4  ;;  %v98_v24 = vsel %vm93_vm3, %v95_v15, %v97_v18  ;;  %v119_v26 = vrot.slane %v1312_v6, 4  ;;  %s1266_s26 = smov 20   ;;  %s1267_s27 = smov 24   ;;  %v259_v51 = vld [vmem:[%s1609_s1] sm:$0xff] }
   0xa   :  { %v96_v25 = vsel %vm93_vm3, %v94_v19, %v95_v15  ;;  %v116_v27 = vrot.slane %v1309_v5, 4  ;;  %v31_v28 = vrot.slane %v21_v21, 4  ;;  %vm138_vm4 = vcmask 1042432   ;;  %v260_v52 = vld [vmem:[%s1609_s1 + $0x8] sm:$0xff]  ;;  %s1268_s6 = smov 28   ;;  %v261_v59 = vld [vmem:[%s1609_s1 + $0x10] sm:$0xff] }
   0xb   :  { %v140_v29 = vrot.slane %v1306_v4, 5  ;;  %v142_v30 = vrot.slane %v1312_v6, 5  ;;  %v120_v31 = vsel %vm26_vm0, %v117_v22, %v119_v26  ;;  %v139_v33 = vrot.slane %v1309_v5, 5  ;;  %v1397_v60 = vld [vmem:[%s1609_s1 + $0x18] sm:$0xff]  ;;  %v263_v9 = vld [vmem:[%s1609_s1 + $0x20] sm:$0xf] }
   0xc   :  { %83 = vrot.lane.b32.xlu1 %v75_v16, %s1262_s19  ;;  %60 = vrot.lane.b32.xlu0 %v52_v17, %s1263_s20  ;;  %v118_v32 = vsel %vm26_vm0, %v116_v27, %v117_v22  ;;  %v1350_v34 = vsel %vm26_vm0, 0.0, %v30_v23  ;;  %v1353_v35 = vsel %vm26_vm0, %v30_v23, %v31_v28  ;;  %v162_v40 = vrot.slane %v1309_v5, 6  ;;  %s1269_s13 = smov 32   ;;  %s1271_s15 = smov [#allocation2]  }
   0xd   :  { %v143_v36 = vsel %vm138_vm4, %v140_v29, %v142_v30  ;;  %v53_v37 = vrot.slane %v1350_v34, 1  ;;  %v141_v38 = vsel %vm138_vm4, %v139_v33, %v140_v29  ;;  %v54_v39 = vrot.slane %v1353_v35, 1  ;;  %s954_s16 = sshll.u32 %s1271_s15, 4  ;;  %s955_s16 = int_to_ptr.vmem [resolvable:$true] %s954_s16 }
   0xe   :  { %v163_v41 = vrot.slane %v1306_v4, 6  ;;  %vm161_vm5 = vcmask 1041408   ;;  %v185_v42 = vrot.slane %v1309_v5, 7  ;;  %v186_v43 = vrot.slane %v1306_v4, 7  ;;  %p1219_p1 = scmp.lt.s32.totalorder %s955_s16, %s955_s16 }
   0xf   :  { %v55_v44 = vsel %vm47_vm2, %v53_v37, %v54_v39  ;;  %vm184_vm6 = vcmask 1040384   ;;  %v165_v46 = vrot.slane %v1312_v6, 6  ;;  %v1371_v47 = vsel %vm26_vm0, %v31_v28, 0.0 }
  0x10   :  { %106 = vrot.lane.b32.xlu1 %v98_v24, %s1264_s25  ;;  %104 = vrot.lane.b32.xlu0 %v96_v25, %s1264_s25  ;;  %v164_v45 = vsel %vm161_vm5, %v162_v40, %v163_v41  ;;  %v187_v48 = vsel %vm184_vm6, %v185_v42, %v186_v43  ;;  %v76_v49 = vrot.slane %v1350_v34, 2  ;;  %v77_v50 = vrot.slane %v1353_v35, 2 }
  0x11   :  { %v166_v53 = vsel %vm161_vm5, %v163_v41, %v165_v46  ;;  %v56_v54 = vrot.slane %v1371_v47, 1  ;;  %v288_v55 = vand.u32 4294901760, %v259_v51  ;;  %v291_v56 = vand.u32 4294901760, %v260_v52 }
  0x12   :  { %v188_v58 = vrot.slane %v1312_v6, 7  ;;  %v78_v61 = vsel %vm70_vm1, %v76_v49, %v77_v50  ;;  %v294_v63 = vand.u32 4294901760, %v261_v59  ;;  %v297_v0 = vand.u32 4294901760, %v1397_v60 }
  0x13   :  { %v1386_v57 = vpack.c.bf16 %v291_v56, %v288_v55  ;;  %v57_v62 = vsel %vm47_vm2, %v54_v39, %v56_v54  ;;  %v99_v3 = vrot.slane %v1350_v34, 3  ;;  %v100_v7 = vrot.slane %v1353_v35, 3 }
  0x14   :  { %128 = vrot.lane.b32.xlu1 %v120_v31, %s1265_s0  ;;  %126 = vrot.lane.b32.xlu0 %v118_v32, %s1265_s0  ;;  %v1406_v1 = vpack.c.bf16 %v297_v0, %v294_v63  ;;  %v189_v2 = vsel %vm184_vm6, %v186_v43, %v188_v58  ;;  %v79_v8 = vrot.slane %v1371_v47, 2  ;;  %v1421_v10 = vsel %vm26_vm0, %v263_v9, 0 }
  0x15   :  { %1155 = vmatprep.subr.bf16.mxu0 %v1386_v57  ;;  %1131 = vmatprep.subr.bf16.mxu1 %v1386_v57  ;;  %v1425_v11 = vand.u32 4294901760, %v1421_v10  ;;  %v101_v12 = vsel %vm93_vm3, %v99_v3, %v100_v7  ;;  %v102_v14 = vrot.slane %v1371_v47, 3  ;;  %v122_v16 = vrot.slane %v1353_v35, 4 }
  0x16   :  { %1157 = vmatpush3.bf16.msra.mxu0 %v1386_v57  ;;  %1133 = vmatpush3.bf16.msra.mxu1 %v1386_v57  ;;  %v80_v13 = vsel %vm70_vm1, %v77_v50, %v79_v8  ;;  %v124_v17 = vrot.slane %v1371_v47, 4  ;;  %v121_v18 = vrot.slane %v1350_v34, 4  ;;  %v145_v19 = vrot.slane %v1353_v35, 5 }
  0x17   :  { %1159 = vmatprep.subr.bf16.mxu0 %v1406_v1  ;;  %1135 = vmatprep.subr.bf16.mxu1 %v1406_v1  ;;  %v103_v15 = vsel %vm93_vm3, %v100_v7, %v102_v14  ;;  %v147_v20 = vrot.slane %v1371_v47, 5  ;;  %v144_v23 = vrot.slane %v1350_v34, 5  ;;  %v399_v24 = vsub.f32 %v259_v51, %v288_v55 }
  0x18   :  { %151 = vrot.lane.b32.xlu1 %v143_v36, %s1266_s26  ;;  %149 = vrot.lane.b32.xlu0 %v141_v38, %s1266_s26  ;;  %v125_v21 = vsel %vm26_vm0, %v122_v16, %v124_v17  ;;  %v123_v22 = vsel %vm26_vm0, %v121_v18, %v122_v16  ;;  %v406_v25 = vsub.f32 %v260_v52, %v291_v56  ;;  %v170_v27 = vrot.slane %v1371_v47, 6 }
  0x19   :  { %v148_v26 = vsel %vm138_vm4, %v145_v19, %v147_v20  ;;  %v146_v28 = vsel %vm138_vm4, %v144_v23, %v145_v19  ;;  %v167_v29 = vrot.slane %v1350_v34, 6  ;;  %v400_v30 = vand.u32 4294901760, %v399_v24 }
  0x1a   :  { %1161 = vmatpush3.bf16.msra.mxu0 %v1406_v1  ;;  %1137 = vmatpush3.bf16.msra.mxu1 %v1406_v1  ;;  %v407_v31 = vand.u32 4294901760, %v406_v25  ;;  %v191_v32 = vrot.slane %v1353_v35, 7  ;;  %v413_v38 = vsub.f32 %v261_v59, %v294_v63  ;;  %v193_v40 = vrot.slane %v1371_v47, 7 }
  0x1b   :  { %1090 = vmatprep.subr.mxu0 %v1425_v11  ;;  %1042 = vmatprep.subr.mxu1 %v1425_v11  ;;  %v401_v36 = vsub.f32 %v399_v24, %v400_v30  ;;  %v190_v41 = vrot.slane %v1350_v34, 7  ;;  %v420_v42 = vsub.f32 %v1397_v60, %v297_v0  ;;  %v1486_v59 = vpack.c.bf16 %v406_v25, %v399_v24 }
  0x1c   :  { %62 = vrot.lane.b32.xlu1 %v55_v44, %s1263_s20  ;;  %172 = vrot.lane.b32.xlu0 %v164_v45, %s1267_s27  ;;  %v1459_v33 = vpack.c.bf16 %v407_v31, %v400_v30  ;;  %v408_v37 = vsub.f32 %v406_v25, %v407_v31  ;;  %v414_v46 = vand.u32 4294901760, %v413_v38  ;;  %vm219_vm7 = vcmask 31744  }
  0x1d   :  { %v402_v44 = vand.u32 4294901760, %v401_v36  ;;  %v192_v54 = vsel %vm184_vm6, %v190_v41, %v191_v32  ;;  %v1488_v60 = vpack.c.bf16 %v420_v42, %v413_v38  ;;  %vm224_vm8 = vcmask 64512  }
  0x1e   :  { %1091 = vmatpush3.msra.mxu0 %v1425_v11  ;;  %1043 = vmatpush3.msra.mxu1 %v1425_v11  ;;  %v409_v45 = vand.u32 4294901760, %v408_v37  ;;  %v415_v50 = vsub.f32 %v413_v38, %v414_v46  ;;  %vm229_vm9 = vcmask 97280   ;;  %vm234_vm10 = vcmask 130048  }
  0x1f   :  { %1163 = vmatprep.subr.bf16.mxu0 %v1459_v33  ;;  %vm239_vm11 = vcmask 162816   ;;  %vm244_vm12 = vcmask 195584   ;;  %vm249_vm13 = vcmask 228352   ;;  %vm254_vm14 = vcmask 261120  }
  0x20   :  { %195 = vrot.lane.b32.xlu1 %v187_v48, %s1268_s6  ;;  %174 = vrot.lane.b32.xlu0 %v166_v53, %s1267_s27  ;;  %v421_v48 = vand.u32 4294901760, %v420_v42  ;;  %v1469_v49 = vpack.c.bf16 %v409_v45, %v402_v44  ;;  %v194_v53 = vsel %vm184_vm6, %v191_v32, %v193_v40  ;;  %v416_v55 = vand.u32 4294901760, %v415_v50 }
  0x21   :  { %vm271_vm15 = vcmask 293888   ;;  %v1523_v50 = vsub.f32 %v1421_v10, %v1425_v11 }
  0x22   :  { %v1473_v51 = vpack.c.bf16 %v421_v48, %v414_v46  ;;  %v422_v52 = vsub.f32 %v420_v42, %v421_v48  ;;  %1139 = vmatprep.subr.bf16.mxu1 %v1469_v49 }
  0x24   :  { %85 = vrot.lane.b32.xlu1 %v78_v61, %s1262_s19  ;;  %64 = vrot.lane.b32.xlu0 %v57_v62, %s1263_s20  ;;  %v423_v56 = vand.u32 4294901760, %v422_v52 }
  0x26   :  { %v1480_v58 = vpack.c.bf16 %v423_v56, %v416_v55  ;;  %v428_v56 = vand.u32 4294901760, %v1523_v50 }
  0x28   :  { %207 = vrot.lane.b32.xlu1 %v1306_v4, %s1269_s13  ;;  %197 = vrot.lane.b32.xlu0 %v189_v2, %s1268_s6  ;;  %v429_v10 = vsub.f32 %v1523_v50, %v428_v56 }
  0x2c   :  { %108 = vrot.lane.b32.xlu1 %v101_v12, %s1264_s25  ;;  %87 = vrot.lane.b32.xlu0 %v80_v13, %s1262_s19 }
  0x30   :  { %110 = vrot.lane.b32.xlu1 %v103_v15, %s1264_s25  ;;  %209 = vrot.lane.b32.xlu0 %v1312_v6, %s1269_s13  ;;  %v168_v6 = vrot.slane %v1353_v35, 6 }
  0x32   :  { %v171_v39 = vsel %vm161_vm5, %v168_v6, %v170_v27  ;;  %v169_v43 = vsel %vm161_vm5, %v167_v29, %v168_v6 }
  0x34   :  { %132 = vrot.lane.b32.xlu1 %v125_v21, %s1265_s0  ;;  %130 = vrot.lane.b32.xlu0 %v123_v22, %s1265_s0 }
  0x38   :  { %155 = vrot.lane.b32.xlu1 %v148_v26, %s1266_s26  ;;  %153 = vrot.lane.b32.xlu0 %v146_v28, %s1266_s26 }
  0x3c   :  { %178 = vrot.lane.b32.xlu1 %v171_v39, %s1267_s27  ;;  %176 = vrot.lane.b32.xlu0 %v169_v43, %s1267_s27 }
  0x40   :  { %201 = vrot.lane.b32.xlu1 %v194_v53, %s1268_s6  ;;  %199 = vrot.lane.b32.xlu0 %v192_v54, %s1268_s6 }
  0x44   :  { %213 = vrot.lane.b32.xlu1 %v1371_v47, %s1269_s13  ;;  %211 = vrot.lane.b32.xlu0 %v1353_v35, %s1269_s13 }
  0x7a   :  { %v82_v61 = vpop.permute.xlu1 %81  ;;  %v59_v62 = vpop.permute.xlu0 %58 }
  0x7b   :  { %v220_v14 = vsel %vm219_vm7, %v1309_v5, %v59_v62 }
  0x7c   :  { %v225_v17 = vsel %vm224_vm8, %v220_v14, %v82_v61 }
  0x7e   :  { %v84_v63 = vpop.permute.xlu1 %83  ;;  %v61_v0 = vpop.permute.xlu0 %60 }
  0x7f   :  { %v221_v23 = vsel %vm219_vm7, %v1306_v4, %v61_v0 }
  0x80   :  { %v226_v28 = vsel %vm224_vm8, %v221_v23, %v84_v63 }
  0x82   :  { %v107_v2 = vpop.permute.xlu1 %106  ;;  %v105_v3 = vpop.permute.xlu0 %104 }
  0x83   :  { %v230_v18 = vsel %vm229_vm9, %v225_v17, %v105_v3  ;;  %v231_v30 = vsel %vm229_vm9, %v226_v28, %v107_v2 }
  0x86   :  { %v129_v7 = vpop.permute.xlu1 %128  ;;  %v127_v8 = vpop.permute.xlu0 %126 }
  0x87   :  { %v235_v21 = vsel %vm234_vm10, %v230_v18, %v127_v8  ;;  %v236_v36 = vsel %vm234_vm10, %v231_v30, %v129_v7 }
  0x8a   :  { %v152_v9 = vpop.permute.xlu1 %151  ;;  %v150_v12 = vpop.permute.xlu0 %149 }
  0x8b   :  { %v240_v22 = vsel %vm239_vm11, %v235_v21, %v150_v12  ;;  %v241_v37 = vsel %vm239_vm11, %v236_v36, %v152_v9  ;;  %v430_v12 = vand.u32 4294901760, %v429_v10 }
  0x8e   :  { %v1490_v13 = vpop.permute.xlu1 %62  ;;  %v173_v47 = vpop.permute.xlu0 %172 }
  0x8f   :  { %v245_v5 = vsel %vm244_vm12, %v240_v22, %v173_v47  ;;  %v222_v7 = vsel %vm219_vm7, %v1350_v34, %v1490_v13 }
  0x92   :  { %v196_v15 = vpop.permute.xlu1 %195  ;;  %v175_v16 = vpop.permute.xlu0 %174 }
  0x93   :  { %v250_v24 = vsel %vm249_vm13, %v245_v5, %v196_v15  ;;  %v246_v38 = vsel %vm244_vm12, %v241_v37, %v175_v16 }
  0x96   :  { %v86_v19 = vpop.permute.xlu1 %85  ;;  %v65_v20 = vpop.permute.xlu0 %64 }
  0x97   :  { %v223_v8 = vsel %vm219_vm7, %v1353_v35, %v65_v20 }
  0x9a   :  { %v208_v25 = vpop.permute.xlu1 %207  ;;  %v198_v26 = vpop.permute.xlu0 %197 }
  0x9b   :  { %v255_v6 = vsel %vm254_vm14, %v250_v24, %v208_v25  ;;  %v251_v40 = vsel %vm249_vm13, %v246_v38, %v198_v26 }
  0x9c   :  { %v273_v27 = vsel %vm271_vm15, %v255_v6, 0 }
  0x9d   :  { %v1505_v29 = vand.u32 4294901760, %v273_v27 }
  0x9e   :  { %v109_v31 = vpop.permute.xlu1 %108  ;;  %v88_v32 = vpop.permute.xlu0 %87 }
  0x9f   :  { %v1510_v4 = vsub.f32 %v273_v27, %v1505_v29  ;;  %v228_v9 = vsel %vm224_vm8, %v223_v8, %v88_v32 }
  0xa1   :  { %v359_v39 = vand.u32 4294901760, %v1510_v4 }
  0xa2   :  { %v111_v41 = vpop.permute.xlu1 %110  ;;  %v210_v42 = vpop.permute.xlu0 %209 }
  0xa3   :  { %v256_v43 = vsel %vm254_vm14, %v251_v40, %v210_v42  ;;  %1092 = vmatprep.mubr.f32.mxu0 %v359_v39  ;;  %v360_v44 = vsub.f32 %v1510_v4, %v359_v39  ;;  %v233_v14 = vsel %vm229_vm9, %v228_v9, %v111_v41 }
  0xa4   :  { %v276_v45 = vsel %vm271_vm15, %v256_v43, 0 }
  0xa5   :  { %v1519_v46 = vand.u32 4294901760, %v276_v45  ;;  %v361_v48 = vand.u32 4294901760, %v360_v44 }
  0xa6   :  { %v133_v52 = vpop.permute.xlu1 %132  ;;  %v131_v53 = vpop.permute.xlu0 %130 }
  0xa7   :  { %v1526_v54 = vsub.f32 %v276_v45, %v1519_v46  ;;  %1044 = vmatprep.mubr.f32.mxu1 %v361_v48  ;;  %v238_v35 = vsel %vm234_vm10, %v233_v14, %v133_v52 }
  0xa9   :  { %v369_v55 = vand.u32 4294901760, %v1526_v54 }
  0xaa   :  { %v156_v61 = vpop.permute.xlu1 %155  ;;  %v154_v62 = vpop.permute.xlu0 %153 }
  0xab   :  { %1093 = vmatmul.mubr.f32.vlgmr.msra.gmra.mrb[0].mxu0 %v369_v55  ;;  %v370_v63 = vsub.f32 %v1526_v54, %v369_v55 }
  0xac   :  { %1165 = vmatpush3.bf16.msra.mxu0 %v1459_v33  ;;  %v227_v33 = vsel %vm224_vm8, %v222_v7, %v86_v19 }
  0xad   :  { %v371_v0 = vand.u32 4294901760, %v370_v63  ;;  %1167 = vmatprep.subr.bf16.mxu0 %v1473_v51  ;;  %v232_v47 = vsel %vm229_vm9, %v227_v33, %v109_v31 }
  0xae   :  { %v179_v2 = vpop.permute.xlu1 %178  ;;  %v177_v3 = vpop.permute.xlu0 %176 }
  0xaf   :  { %1045 = vmatmul.mubr.f32.vlgmr.msra.gmra.mrb[0].mxu1 %v371_v0 }
  0xb0   :  { %1141 = vmatpush3.bf16.msra.mxu1 %v1469_v49  ;;  %1169 = vmatpush3.bf16.msra.mxu0 %v1473_v51  ;;  %v237_v49 = vsel %vm234_vm10, %v232_v47, %v131_v53  ;;  %v243_v51 = vsel %vm239_vm11, %v238_v35, %v156_v61 }
  0xb1   :  { %1143 = vmatprep.subr.bf16.mxu1 %v1480_v58  ;;  %1106 = vmatprep.subr.mxu0 %v428_v56  ;;  %v242_v15 = vsel %vm239_vm11, %v237_v49, %v154_v62  ;;  %v248_v16 = vsel %vm244_vm12, %v243_v51, %v179_v2 }
  0xb2   :  { %v202_v34 = vpop.permute.xlu1 %201  ;;  %v200_v13 = vpop.permute.xlu0 %199  ;;  %v247_v17 = vsel %vm244_vm12, %v242_v15, %v177_v3 }
  0xb3   :  { %v253_v18 = vsel %vm249_vm13, %v248_v16, %v202_v34  ;;  %v252_v19 = vsel %vm249_vm13, %v247_v17, %v200_v13 }
  0xb4   :  { %1145 = vmatpush3.bf16.msra.mxu1 %v1480_v58  ;;  %1107 = vmatpush3.msra.mxu0 %v428_v56 }
  0xb5   :  { %1171 = vmatprep.subr.bf16.mxu0 %v1386_v57  ;;  %1058 = vmatprep.subr.mxu1 %v430_v12 }
  0xb6   :  { %v214_v20 = vpop.permute.xlu1 %213  ;;  %v212_v21 = vpop.permute.xlu0 %211 }
  0xb7   :  { %v258_v22 = vsel %vm254_vm14, %v253_v18, %v214_v20  ;;  %v257_v5 = vsel %vm254_vm14, %v252_v19, %v212_v21 }
  0xb8   :  { %v282_v58 = vsel %vm271_vm15, %v258_v22, 0  ;;  %v279_v23 = vsel %vm271_vm15, %v257_v5, 0  ;;  %1059 = vmatpush3.msra.mxu1 %v430_v12 }
  0xb9   :  { %v387_v24 = vand.u32 4294901760, %v282_v58  ;;  %v377_v25 = vand.u32 4294901760, %v279_v23  ;;  %1147 = vmatprep.subr.bf16.mxu1 %v1486_v59 }
  0xbb   :  { %v388_v26 = vsub.f32 %v282_v58, %v387_v24  ;;  %v378_v6 = vsub.f32 %v279_v23, %v377_v25 }
  0xbd   :  { %v379_v27 = vand.u32 4294901760, %v378_v6  ;;  %v389_v28 = vand.u32 4294901760, %v388_v26 }
  0xbf   :  { %1095 = vmatprep.mubr.f32.mxu0 %v379_v27  ;;  %v380_v30 = vsub.f32 %v378_v6, %v379_v27  ;;  %v390_v31 = vsub.f32 %v388_v26, %v389_v28 }
  0xc0   :  { %1096 = vmatmul.mubr.f32.gmra.mrb[2].mxu0 %v389_v28 }
  0xc1   :  { %1108 = vmatprep.mubr.f32.mxu0 %v1505_v29  ;;  %v381_v32 = vand.u32 4294901760, %v380_v30  ;;  %v391_v36 = vand.u32 4294901760, %v390_v31 }
  0xc3   :  { %1047 = vmatprep.mubr.f32.mxu1 %v381_v32 }
  0xc4   :  { %1048 = vmatmul.mubr.f32.gmra.mrb[2].mxu1 %v391_v36  ;;  %1109 = vmatmul.mubr.f32.vlgmr.msra.gmra.mrb[0].mxu0 %v1519_v46 }
  0xc5   :  { %1173 = vmatpush3.bf16.msra.mxu0 %v1386_v57  ;;  %1060 = vmatprep.mubr.f32.mxu1 %v1505_v29  ;;  %v1270_v57 = vmov 0.0  }
  0xc6   :  { %1111 = vmatprep.mubr.f32.mxu0 %v377_v25  ;;  %1175 = vmatprep.subr.bf16.mxu0 %v1406_v1  ;;  %944 = vst [vmem:[#allocation4] sm:$0x3] %v1270_v57 }
  0xc8   :  { %1061 = vmatmul.mubr.f32.vlgmr.msra.gmra.mrb[0].mxu1 %v1519_v46  ;;  %1112 = vmatmul.mubr.f32.gmra.mrb[2].mxu0 %v387_v24 }
  0xc9   :  { %1149 = vmatpush3.bf16.msra.mxu1 %v1486_v59  ;;  %1177 = vmatpush3.bf16.msra.mxu0 %v1406_v1 }
  0xca   :  { %1063 = vmatprep.mubr.f32.mxu1 %v377_v25  ;;  %1124 = vmatprep.mubr.f32.mxu0 %v1505_v29 }
  0xcb   :  { %1151 = vmatprep.subr.bf16.mxu1 %v1488_v60  ;;  %1122 = vmatprep.subr.mxu0 %v1425_v11 }
  0xcc   :  { %1064 = vmatmul.mubr.f32.gmra.mrb[2].mxu1 %v387_v24 }
  0xcd   :  { %1153 = vmatpush3.bf16.msra.mxu1 %v1488_v60  ;;  %1123 = vmatpush3.msra.mxu0 %v1425_v11  ;;  %v979_v11 = vld [vmem:[%s1610_s2] ss:$0 sm:$0xff]  ;;  %s1214_s2 = scalar_lea.vmem %s955_s16, 512 }
  0xce   :  { %1076 = vmatprep.mubr.f32.mxu1 %v1510_v4  ;;  %1125 = vmatmul.mubr.f32.vlgmr.msra.gmra.mrb[0].mxu0 %v1519_v46  ;;  %p1215_p0 = scmp.ne.s32.totalorder %s955_s16, %s1214_s2  ;;  %p1220_p2 = scmp.lt.s32.totalorder %s1214_s2, %s1214_s2 }
  0xcf   :  { %1127 = vmatprep.mubr.f32.mxu0 %v377_v25  ;;  %1074 = vmatprep.subr.mxu1 %v1523_v50 }
  0xd0   :  { %p1221_p3 = por %p1220_p2, %p1219_p1 }
  0xd1   :  { %1075 = vmatpush3.msra.mxu1 %v1523_v50 }
  0xd2   :  { %1077 = vmatmul.mubr.f32.vlgmr.msra.gmra.mrb[0].mxu1 %v1526_v54  ;;  %1128 = vmatmul.mubr.f32.gmra.mrb[2].mxu0 %v387_v24  ;;  %p1222_p4 = pnand %p1221_p3, %p1215_p0 }
  0xd3   :  { %1079 = vmatprep.mubr.f32.mxu1 %v378_v6 }
  0xd6   :  { %1080 = vmatmul.mubr.f32.gmra.mrb[2].mxu1 %v388_v26 }
 0x1a1   :  { %v1126_v1 = vpop.f32.mrb[0].mxu0 }
 0x1a2   :  { %v892_v59 = vpop.f32.mrb[1].mxu0 }
 0x1a5   :  { %v1078_v60 = vpop.f32.mrb[0].mxu1  ;;  %v1129_v29 = vpop.f32.mrb[2].mxu0 }
 0x1a6   :  { %v1178_v4 = vadd.f32 %v1078_v60, %v979_v11  ;;  %v589_v37 = vpop.f32.mrb[1].mxu1  ;;  %v904_v38 = vpop.f32.mrb[3].mxu0 }
 0x1a7   :  { %v1180_v39 = vadd.f32 %v979_v11, %v589_v37 }
 0x1a8   :  { %v1179_v40 = vadd.f32 %v1178_v4, %v1126_v1 }
 0x1a9   :  { %v1181_v41 = vadd.f32 %v1180_v39, %v892_v59  ;;  %v1081_v42 = vpop.f32.mrb[2].mxu1 }
 0x1aa   :  { %915 = vst [vmem:[#allocation2 + $0x8] sm:$0xff] %v1179_v40  ;;  %v928_v43 = vmul.f32 %v1179_v40, %v1179_v40  ;;  %v1182_v44 = vadd.f32 %v1081_v42, %v979_v11  ;;  %v603_v45 = vpop.f32.mrb[3].mxu1 }
 0x1ab   :  { %914 = vst [vmem:[#allocation2] sm:$0xff] %v1181_v41  ;;  %v918_v46 = vadd.f32 %v1181_v41, %v1179_v40  ;;  %v927_v48 = vmul.f32 %v1181_v41, %v1181_v41  ;;  %v1184_v50 = vadd.f32 %v979_v11, %v603_v45 }
 0x1ac   :  { %v1183_v52 = vadd.f32 %v1182_v44, %v1129_v29 }
 0x1ad   :  { %v931_v53 = vadd.f32 %v928_v43, %v927_v48  ;;  %v1185_v54 = vadd.f32 %v1184_v50, %v904_v38 }
 0x1ae   :  { %917 = vst [vmem:[#allocation2 + $0x18] sm:$0xff] %v1183_v52 }
 0x1af   :  { %916 = vst [vmem:[#allocation2 + $0x10] sm:$0xff] %v1185_v54  ;;  %v919_v55 = vadd.f32 %v1185_v54, %v918_v46  ;;  %v929_v56 = vmul.f32 %v1185_v54, %v1185_v54 }
 0x1b0   :  { %1225 = shalt.err (!%p1222_p4)
}
 0x1b1   :  { %s1226_s20 = scalar_lea.hbm %s1611_s3, 512 }
 0x1b2   :  { %p1227_p5 = scmp.ne.s32.totalorder %s1611_s3, %s1226_s20  ;;  %p1230_p6 = scmp.lt.u32.totalorder %s1226_s20, %s1611_s3 }
 0x1b4   :  { %p1232_p7 = pnand %p1230_p6, %p1227_p5 }
 0x1b6   :  { %1235 = shalt.err (!%p1232_p7)
}
 0x1b7   :  { %s1272_s25 = smov 128   ;;  %v930_v61 = vmul.f32 %v1183_v52, %v1183_v52  ;;  %v920_v62 = vadd.f32 %v1183_v52, %v919_v55  ;;  %v932_v63 = vadd.f32 %v931_v53, %v929_v56  ;;  %v945_v35 = vld [vmem:[#allocation4] sm:$0x3]  ;;  %s1273_s27 = smov [#allocation4]  }
 0x1b8   :  { %960 = dma.vmem_to_hbm [thread:$0]  %s955_s16, 512, %s1611_s3, [#allocation3], %s1272_s25, %s1272_s25, %s1262_s19  }
 0x1b9   :  { %v921_v0 = vrot.slane %v920_v62, 4  ;;  %v933_v10 = vadd.f32 %v932_v63, %v930_v61  ;;  %s967_s28 = sshll.u32 %s1273_s27, 4  ;;  %s968_s28 = int_to_ptr.vmem [resolvable:$true] %s967_s28 }
 0x1ba   :  { %s1236_s3 = scalar_lea.vmem %s968_s28, 32  ;;  %p1241_p9 = scmp.lt.s32.totalorder %s968_s28, %s968_s28 }
 0x1bb   :  { %v922_v2 = vadd.f32 %v921_v0, %v920_v62  ;;  %v934_v3 = vrot.slane %v933_v10, 4  ;;  %p1237_p8 = scmp.ne.s32.totalorder %s968_s28, %s1236_s3  ;;  %p1242_p10 = scmp.lt.s32.totalorder %s1236_s3, %s1236_s3 }
 0x1bd   :  { %v923_v7 = vrot.slane %v922_v2, 2  ;;  %v935_v8 = vadd.f32 %v934_v3, %v933_v10  ;;  %p1243_p11 = por %p1242_p10, %p1241_p9 }
 0x1bf   :  { %v924_v33 = vadd.f32 %v923_v7, %v922_v2  ;;  %v936_v9 = vrot.slane %v935_v8, 2  ;;  %p1244_p12 = pnand %p1243_p11, %p1237_p8 }
 0x1c1   :  { %v925_v12 = vrot.slane %v924_v33, 1  ;;  %v937_v47 = vadd.f32 %v936_v9, %v935_v8 }
 0x1c3   :  { %v938_v14 = vrot.slane %v937_v47, 1  ;;  %v926_v34 = vadd.f32 %v925_v12, %v924_v33 }
 0x1c5   :  { %v939_v13 = vadd.f32 %v938_v14, %v937_v47 }
 0x1c7   :  { %v946_v49 = vsel %vm184_vm6, %v926_v34, %v939_v13 }
 0x1c8   :  { %v947_v51 = vadd.f32 %v946_v49, %v945_v35 }
 0x1ca   :  { %948 = vst [vmem:[#allocation4] sm:$0x3] %v947_v51 }
 0x1cb   :  { %1247 = shalt.err (!%p1244_p12)
}
 0x1cc   :  { %s1248_s30 = scalar_lea.hbm %s1612_s4, 32 }
 0x1cd   :  { %p1249_p13 = scmp.ne.s32.totalorder %s1612_s4, %s1248_s30  ;;  %p1252_p0 = scmp.lt.u32.totalorder %s1248_s30, %s1612_s4 }
 0x1cf   :  { %p1254_p1 = pnand %p1252_p0, %p1249_p13 }
 0x1d1   :  { %1257 = shalt.err (!%p1254_p1)
}
 0x1d2   :  { %970 = dma.vmem_to_hbm [thread:$0]  %s968_s28, 32, %s1612_s4, [#allocation5]  }
 0x1d3   :  { %1258 = dma.done.wait [#allocation3], 512  }
 0x1d4   :  { %1259 = vsyncadd [#allocation3], 4294966784 }
 0x1d5   :  { %1260 = dma.done.wait [#allocation5], 32  }
 0x1d6   :  { %1261 = vsyncadd [#allocation5], 4294967264 }
 0x1d7   :  { %977 = vsyncpa [#allocation3], 1 }
 0x1d8   :  { %978 = vsyncpa [#allocation5], 1 }

</bundles_post_ra>
